<compile_context>
chip_gen: v5e
topology: v5e:2x2
jax: 0.10.0
libtpu: 0.0.40
codegen_flags: <defaults>
</compile_context>

<pallas_src>
import math

import jax
import jax.numpy as jnp
from jax.experimental import pallas as pl
from jax.experimental.pallas import tpu as pltpu

_LANE = 128
_SUBLANE = 8
_THRESHOLD = 1.0
# Conservative double-buffered tile budget: fits v5e's 16 MiB default scoped
# VMEM and leaves headroom on v7x's 64 MiB physical VMEM.
_VMEM_BUDGET = 12 * 1024 * 1024
_VMEM_LIMIT = 32 * 1024 * 1024


def _round_up(n: int, m: int) -> int:
    return ((n + m - 1) // m) * m


def _vmem_bytes(tm: int, tk: int, tn: int) -> int:
    # double-buffered x(f32) + w(bf16) + bias + mem_in(f32) + spk(bf16)
    # + mem_out(f32), plus 2 f32 scratch tiles.
    return (2 * tm * tk * 4 + 2 * tk * tn * 2 + 2 * tn * 4
            + 2 * tm * tn * 4 + 2 * tm * tn * 2 + 2 * tm * tn * 4
            + 2 * tm * tn * 4)


def _pick_tn(out_p: int) -> int:
    # Largest lane-dense tile that still leaves >=2 output tiles when the
    # layer is wide enough (so v7x's second TensorCore gets work).
    for cand in (512, 256, 128):
        if out_p % cand == 0 and out_p // cand >= 2:
            return cand
    return min(out_p, 512)


def _pick_tk(inp: int, tn: int):
    """Returns (tk, inp_padded). Full-K when it fits the budget, else K-tiled."""
    tm = 256  # worst-case batch tile assumed for the budget check
    if _vmem_bytes(tm, inp, tn) <= _VMEM_BUDGET:
        return inp, inp                      # single K tile, no K padding
    for tk in (512, 256, 128):
        if _vmem_bytes(tm, tk, tn) <= _VMEM_BUDGET:
            return tk, _round_up(inp, tk)
    return 128, _round_up(inp, 128)


def _lif_kernel(x_ref, w_ref, b_ref, mem_in_ref, spk_ref, mem_out_ref,
                acc_ref, mem_ref):
    """Grid = (out tile j, batch tile i, time t, K tile k); k innermost."""
    t = pl.program_id(2)
    k = pl.program_id(3)
    last_t = pl.num_programs(2) - 1
    last_k = pl.num_programs(3) - 1

    @pl.when((t == 0) & (k == 0))
    def _():                                   # load carried state once per tile
        mem_ref[...] = mem_in_ref[...]

    @pl.when(k == 0)
    def _():
        acc_ref[...] = jnp.zeros_like(acc_ref)

    # Single-pass bf16 MXU matmul, f32 accumulation.  Weight is pre-cast bf16
    # in [K, N] layout (no per-step RHS relayout); x tile cast on the VPU.
    acc_ref[...] += jnp.dot(x_ref[0].astype(jnp.bfloat16), w_ref[...],
                            preferred_element_type=jnp.float32)

    @pl.when(k == last_k)
    def _():
        thr = jnp.float32(_THRESHOLD)
        cur = acc_ref[...] + b_ref[...]        # bias (1, tn) broadcasts
        mem_prev = mem_ref[...]
        reset = (mem_prev > thr).astype(jnp.float32)
        mem = mem_prev + cur - reset * thr     # beta == 1, subtract reset
        spk_ref[0] = (mem > thr).astype(spk_ref.dtype)
        mem_ref[...] = mem

    @pl.when((t == last_t) & (k == last_k))
    def _():
        mem_out_ref[...] = mem_ref[...]


def lif_linear_prepare(weight, bias):
    """weight: [out, inp] f32 (PyTorch layout), bias: [out] f32.
    One-time pad / transpose / bf16 cast + tile-size selection (amortized
    across all timesteps; constant-folded under jit)."""
    out, inp = weight.shape
    out_p = _round_up(out, _LANE)
    tn = _pick_tn(out_p)
    tk, inp_p = _pick_tk(inp, tn)
    # Padded weight rows/cols and bias entries are zero, so padded output
    # columns stay exactly 0 (mem 0, spk 0) and are sliced off for the user.
    w = jnp.pad(weight, ((0, out_p - out), (0, inp_p - inp))).T  # [K_p, N_p]
    w = w.astype(jnp.bfloat16)
    b = jnp.pad(bias, (0, out_p - out)).astype(jnp.float32).reshape(1, out_p)
    return dict(weight=w, bias=b, inp=inp, out=out,
                inp_p=inp_p, out_p=out_p, tn=tn, tk=tk)


def lif_linear_init_mem(batch, params):
    """Padded zero membrane state (== lif1.init_leaky()), carried padded."""
    return jnp.zeros((_round_up(batch, _SUBLANE), params["out_p"]), jnp.float32)


def lif_linear_seq(params, x_seq, mem):
    """Fused T-timestep LIF layer.
    x_seq: [T, B, inp] f32; mem: padded state from lif_linear_init_mem or a
    previous call.  Returns (spk_seq [T, B, out] bf16 0/1, new padded mem)."""
    T, B, inp = x_seq.shape
    assert inp == params["inp"]
    inp_p, out_p, out = params["inp_p"], params["out_p"], params["out"]
    tn, tk = params["tn"], params["tk"]
    B_p = mem.shape[0]
    assert B_p == _round_up(B, _SUBLANE) and mem.shape[1] == out_p

    if B != B_p or inp != inp_p:
        x_seq = jnp.pad(x_seq, ((0, 0), (0, B_p - B), (0, inp_p - inp)))

    # Batch only gets sublane-8 padding; the cdiv grid lets Pallas mask any
    # tail batch block.  tm capped so the VMEM budget (checked with tm=256
    # in _pick_tk) holds.
    tm = min(B_p, 256)
    grid = (out_p // tn, pl.cdiv(B_p, tm), T, inp_p // tk)

    spk, mem_new = pl.pallas_call(
        _lif_kernel,
        out_shape=(
            jax.ShapeDtypeStruct((T, B_p, out_p), jnp.bfloat16),  # spk (0/1)
            jax.ShapeDtypeStruct((B_p, out_p), jnp.float32),      # new mem
        ),
        grid=grid,
        in_specs=[
            pl.BlockSpec((1, tm, tk), lambda j, i, t, k: (t, i, k)),  # x
            pl.BlockSpec((tk, tn),    lambda j, i, t, k: (k, j)),     # W [K,N] bf16
            pl.BlockSpec((1, tn),     lambda j, i, t, k: (0, j)),     # bias
            pl.BlockSpec((tm, tn),    lambda j, i, t, k: (i, j)),     # mem_in
        ],
        out_specs=(
            pl.BlockSpec((1, tm, tn), lambda j, i, t, k: (t, i, j)),  # spk
            pl.BlockSpec((tm, tn),    lambda j, i, t, k: (i, j)),     # mem_out
        ),
        scratch_shapes=[
            pltpu.VMEM((tm, tn), jnp.float32),   # matmul accumulator (K axis)
            pltpu.VMEM((tm, tn), jnp.float32),   # membrane state across time
        ],
        input_output_aliases={3: 1},             # mem state updated in place
        compiler_params=pltpu.CompilerParams(
            dimension_semantics=("parallel", "parallel", "arbitrary", "arbitrary"),
            vmem_limit_bytes=_VMEM_LIMIT),
    )(x_seq, params["weight"], params["bias"], mem)

    if B != B_p or out != out_p:
        spk = spk[:, :B, :out]
    return spk, mem_new


def nested_network_forward(params, x, mem):
    """One module forward() step: x [B, inp] -> spk [B, out] (bf16 0/1),
    plus the updated padded membrane state to feed back next step."""
    spk_seq, mem_new = lif_linear_seq(params, x[None], mem)
    return spk_seq[0], mem_new


if __name__ == "__main__":
    # Small shapes consistent with the module: batch=8, inp=32, out=32.
    B, INP, OUT = 8, 32, 32

    key = jax.random.PRNGKey(0)
    kx1, kx2, kw, kb = jax.random.split(key, 4)

    # Quantize inputs to coarse binary fractions so every product/sum is exact
    # both on the bf16 MXU path (f32 accumulation) and in the pure-f32
    # reference -> the spike-threshold comparison is bit-deterministic.
    def q(a, scale):
        return jnp.round(a * scale) / scale

    bound = 1.0 / math.sqrt(INP)   # PyTorch Linear init range
    weight = q(jax.random.uniform(kw, (OUT, INP), jnp.float32, -bound, bound), 128.0)
    bias = q(jax.random.uniform(kb, (OUT,), jnp.float32, -bound, bound), 128.0)
    x1 = q(jax.random.uniform(kx1, (B, INP), jnp.float32, -2.0, 2.0), 32.0)
    x2 = q(jax.random.uniform(kx2, (B, INP), jnp.float32, -2.0, 2.0), 32.0)

    # Pure-JAX reference (snn.Leaky beta=1, threshold=1, subtract reset).
    def ref_step(xv, mem_prev):
        cur = xv @ weight.T + bias
        reset = (mem_prev > 1.0).astype(jnp.float32)
        mem = mem_prev + cur - reset
        return (mem > 1.0).astype(jnp.float32), mem

    spk1_ref, mem1_ref = ref_step(x1, jnp.zeros((B, OUT), jnp.float32))
    spk2_ref, mem2_ref = ref_step(x2, mem1_ref)

    params = lif_linear_prepare(weight, bias)

    # --- Per-timestep API (module.forward called once per step). ---
    mem = lif_linear_init_mem(B, params)
    spk1, mem = nested_network_forward(params, x1, mem)
    jax.block_until_ready((spk1, mem))
    assert spk1.shape == (B, OUT)
    assert jnp.array_equal(spk1.astype(jnp.float32), spk1_ref), "step-1 spk mismatch"
    assert jnp.allclose(mem[:B, :OUT], mem1_ref, atol=1e-5), "step-1 mem mismatch"

    spk2, mem = nested_network_forward(params, x2, mem)
    jax.block_until_ready((spk2, mem))
    assert jnp.array_equal(spk2.astype(jnp.float32), spk2_ref), "step-2 spk mismatch"
    assert jnp.allclose(mem[:B, :OUT], mem2_ref, atol=1e-5), "step-2 mem mismatch"

    # --- Fused multi-timestep path (weight stays VMEM-resident across T). ---
    x_seq = jnp.stack([x1, x2])
    spk_seq, mem_T = lif_linear_seq(params, x_seq, lif_linear_init_mem(B, params))
    jax.block_until_ready((spk_seq, mem_T))
    assert jnp.array_equal(spk_seq[0].astype(jnp.float32), spk1_ref), "fused t=0 mismatch"
    assert jnp.array_equal(spk_seq[1].astype(jnp.float32), spk2_ref), "fused t=1 mismatch"
    assert jnp.allclose(mem_T[:B, :OUT], mem2_ref, atol=1e-5), "fused mem mismatch"

    print("KERNEL_OK")
</pallas_src>

<mosaic_0001>
module attributes {stable_mosaic.version = 11 : i64} {
  func.func @_lif_kernel(%arg0: i32, %arg1: i32, %arg2: i32, %arg3: i32, %arg4: memref<1x8x32xf32, #tpu.memory_space<vmem>>, %arg5: memref<32x128xbf16, #tpu.memory_space<vmem>>, %arg6: memref<1x128xf32, #tpu.memory_space<vmem>>, %arg7: memref<8x128xf32, #tpu.memory_space<vmem>>, %arg8: memref<1x8x128xbf16, #tpu.memory_space<vmem>>, %arg9: memref<8x128xf32, #tpu.memory_space<vmem>>, %arg10: memref<8x128xf32, #tpu.memory_space<vmem>>, %arg11: memref<8x128xf32, #tpu.memory_space<vmem>>) attributes {dimension_semantics = [#tpu.dimension_semantics<parallel>, #tpu.dimension_semantics<parallel>, #tpu.dimension_semantics<arbitrary>, #tpu.dimension_semantics<arbitrary>], iteration_bounds = array<i64: 1, 1, 1, 1>, scalar_prefetch = 0 : i64, scratch_operands = 2 : i64, tpu.core_type = #tpu.core_type<tc>, window_params = [{transform_indices = @transform_0, window_bounds = array<i64: 1, 8, 32>}, {transform_indices = @transform_1, window_bounds = array<i64: 32, 128>}, {transform_indices = @transform_2, window_bounds = array<i64: 1, 128>}, {transform_indices = @transform_3, window_bounds = array<i64: 8, 128>}, {transform_indices = @transform_4, window_bounds = array<i64: 1, 8, 128>}, {transform_indices = @transform_5, window_bounds = array<i64: 8, 128>}]} {
    %c0_i32 = arith.constant 0 : i32
    %0 = arith.cmpi eq, %arg2, %c0_i32 : i32
    %c0_i32_0 = arith.constant 0 : i32
    %1 = arith.cmpi eq, %arg3, %c0_i32_0 : i32
    %2 = arith.andi %0, %1 : i1
    %3 = arith.extui %2 : i1 to i32
    %c0_i32_1 = arith.constant 0 : i32
    %4 = arith.cmpi ne, %3, %c0_i32_1 : i32
    scf.if %4 {
      %c0_17 = arith.constant 0 : index
      %c0_18 = arith.constant 0 : index
      %24 = vector.load %arg7[%c0_17, %c0_18] : memref<8x128xf32, #tpu.memory_space<vmem>>, vector<8x128xf32>
      %c0_19 = arith.constant 0 : index
      %c0_20 = arith.constant 0 : index
      %25 = vector.load %arg11[%c0_19, %c0_20] : memref<8x128xf32, #tpu.memory_space<vmem>>, vector<8x128xf32>
      tpu.vector_store %arg11[%c0_19, %c0_20], %24 {strides = array<i32>} : memref<8x128xf32, #tpu.memory_space<vmem>>, vector<8x128xf32>,
    } else {
    }
    %c0_i32_2 = arith.constant 0 : i32
    %5 = arith.cmpi eq, %arg3, %c0_i32_2 : i32
    %6 = arith.extui %5 : i1 to i32
    %c0_i32_3 = arith.constant 0 : i32
    %7 = arith.cmpi ne, %6, %c0_i32_3 : i32
    scf.if %7 {
      %cst_17 = arith.constant 0.000000e+00 : f32
      %24 = vector.broadcast %cst_17 : f32 to vector<8x128xf32>
      %c0_18 = arith.constant 0 : index
      %c0_19 = arith.constant 0 : index
      %25 = vector.load %arg10[%c0_18, %c0_19] : memref<8x128xf32, #tpu.memory_space<vmem>>, vector<8x128xf32>
      tpu.vector_store %arg10[%c0_18, %c0_19], %24 {strides = array<i32>} : memref<8x128xf32, #tpu.memory_space<vmem>>, vector<8x128xf32>,
    } else {
    }
    %c0 = arith.constant 0 : index
    %c0_4 = arith.constant 0 : index
    %8 = vector.load %arg10[%c0, %c0_4] : memref<8x128xf32, #tpu.memory_space<vmem>>, vector<8x128xf32>
    %c0_5 = arith.constant 0 : index
    %c0_6 = arith.constant 0 : index
    %c0_7 = arith.constant 0 : index
    %9 = vector.load %arg4[%c0_5, %c0_6, %c0_7] : memref<1x8x32xf32, #tpu.memory_space<vmem>>, vector<1x8x32xf32>
    %10 = vector.shape_cast %9 : vector<1x8x32xf32> to vector<8x32xf32>
    %11 = arith.truncf %10 : vector<8x32xf32> to vector<8x32xbf16>
    %c0_8 = arith.constant 0 : index
    %c0_9 = arith.constant 0 : index
    %12 = vector.load %arg5[%c0_8, %c0_9] : memref<32x128xbf16, #tpu.memory_space<vmem>>, vector<32x128xbf16>
    %cst = arith.constant dense<0.000000e+00> : vector<8x128xf32>
    %13 = tpu.matmul %11, %12, %cst {dimension_numbers = #tpu.dot_dimension_numbers<[1], [0], [0], [1], [0, 0, 1, 1], [], []>} : vector<8x32xbf16>, vector<32x128xbf16>, vector<8x128xf32> -> vector<8x128xf32>
    %14 = arith.addf %8, %13 : vector<8x128xf32>
    %c0_10 = arith.constant 0 : index
    %c0_11 = arith.constant 0 : index
    %15 = vector.load %arg10[%c0_10, %c0_11] : memref<8x128xf32, #tpu.memory_space<vmem>>, vector<8x128xf32>
    tpu.vector_store %arg10[%c0_10, %c0_11], %14 {strides = array<i32>} : memref<8x128xf32, #tpu.memory_space<vmem>>, vector<8x128xf32>,
    %c0_i32_12 = arith.constant 0 : i32
    %16 = arith.cmpi eq, %arg3, %c0_i32_12 : i32
    %17 = arith.extui %16 : i1 to i32
    %c0_i32_13 = arith.constant 0 : i32
    %18 = arith.cmpi ne, %17, %c0_i32_13 : i32
    scf.if %18 {
      %c0_17 = arith.constant 0 : index
      %c0_18 = arith.constant 0 : index
      %24 = vector.load %arg10[%c0_17, %c0_18] : memref<8x128xf32, #tpu.memory_space<vmem>>, vector<8x128xf32>
      %c0_19 = arith.constant 0 : index
      %c0_20 = arith.constant 0 : index
      %25 = vector.load %arg6[%c0_19, %c0_20] : memref<1x128xf32, #tpu.memory_space<vmem>>, vector<1x128xf32>
      %26 = vector.broadcast %25 : vector<1x128xf32> to vector<8x128xf32>
      %27 = arith.addf %24, %26 : vector<8x128xf32>
      %c0_21 = arith.constant 0 : index
      %c0_22 = arith.constant 0 : index
      %28 = vector.load %arg11[%c0_21, %c0_22] : memref<8x128xf32, #tpu.memory_space<vmem>>, vector<8x128xf32>
      %cst_23 = arith.constant 1.000000e+00 : f32
      %29 = vector.broadcast %cst_23 : f32 to vector<8x128xf32>
      %30 = arith.cmpf ogt, %28, %29 : vector<8x128xf32>
      %31 = arith.extui %30 : vector<8x128xi1> to vector<8x128xi32>
      %32 = arith.sitofp %31 : vector<8x128xi32> to vector<8x128xf32>
      %33 = arith.addf %28, %27 : vector<8x128xf32>
      %cst_24 = arith.constant 1.000000e+00 : f32
      %34 = vector.broadcast %cst_24 : f32 to vector<8x128xf32>
      %35 = arith.mulf %32, %34 : vector<8x128xf32>
      %36 = arith.subf %33, %35 : vector<8x128xf32>
      %cst_25 = arith.constant 1.000000e+00 : f32
      %37 = vector.broadcast %cst_25 : f32 to vector<8x128xf32>
      %38 = arith.cmpf ogt, %36, %37 : vector<8x128xf32>
      %39 = arith.extui %38 : vector<8x128xi1> to vector<8x128xi32>
      %40 = arith.sitofp %39 : vector<8x128xi32> to vector<8x128xf32>
      %41 = arith.truncf %40 : vector<8x128xf32> to vector<8x128xbf16>
      %c0_26 = arith.constant 0 : index
      %c0_27 = arith.constant 0 : index
      %c0_28 = arith.constant 0 : index
      %42 = vector.load %arg8[%c0_26, %c0_27, %c0_28] : memref<1x8x128xbf16, #tpu.memory_space<vmem>>, vector<1x8x128xbf16>
      %43 = vector.shape_cast %42 : vector<1x8x128xbf16> to vector<8x128xbf16>
      %44 = vector.shape_cast %41 : vector<8x128xbf16> to vector<1x8x128xbf16>
      tpu.vector_store %arg8[%c0_26, %c0_27, %c0_28], %44 {strides = array<i32>} : memref<1x8x128xbf16, #tpu.memory_space<vmem>>, vector<1x8x128xbf16>,
      %c0_29 = arith.constant 0 : index
      %c0_30 = arith.constant 0 : index
      %45 = vector.load %arg11[%c0_29, %c0_30] : memref<8x128xf32, #tpu.memory_space<vmem>>, vector<8x128xf32>
      tpu.vector_store %arg11[%c0_29, %c0_30], %36 {strides = array<i32>} : memref<8x128xf32, #tpu.memory_space<vmem>>, vector<8x128xf32>,
    } else {
    }
    %c0_i32_14 = arith.constant 0 : i32
    %19 = arith.cmpi eq, %arg2, %c0_i32_14 : i32
    %c0_i32_15 = arith.constant 0 : i32
    %20 = arith.cmpi eq, %arg3, %c0_i32_15 : i32
    %21 = arith.andi %19, %20 : i1
    %22 = arith.extui %21 : i1 to i32
    %c0_i32_16 = arith.constant 0 : i32
    %23 = arith.cmpi ne, %22, %c0_i32_16 : i32
    scf.if %23 {
      %c0_17 = arith.constant 0 : index
      %c0_18 = arith.constant 0 : index
      %24 = vector.load %arg11[%c0_17, %c0_18] : memref<8x128xf32, #tpu.memory_space<vmem>>, vector<8x128xf32>
      %c0_19 = arith.constant 0 : index
      %c0_20 = arith.constant 0 : index
      %25 = vector.load %arg9[%c0_19, %c0_20] : memref<8x128xf32, #tpu.memory_space<vmem>>, vector<8x128xf32>
      tpu.vector_store %arg9[%c0_19, %c0_20], %24 {strides = array<i32>} : memref<8x128xf32, #tpu.memory_space<vmem>>, vector<8x128xf32>,
    } else {
    }
    return
  }
  func.func @transform_0(%arg0: i32, %arg1: i32, %arg2: i32, %arg3: i32) -> (i32, i32, i32) {
    %c0_i32 = arith.constant 0 : i32
    return %arg2, %arg1, %arg3 : i32, i32, i32
  }
  func.func @transform_1(%arg0: i32, %arg1: i32, %arg2: i32, %arg3: i32) -> (i32, i32) {
    %c0_i32 = arith.constant 0 : i32
    return %arg3, %arg0 : i32, i32
  }
  func.func @transform_2(%arg0: i32, %arg1: i32, %arg2: i32, %arg3: i32) -> (i32, i32) {
    %c0_i32 = arith.constant 0 : i32
    %c0_i32_0 = arith.constant 0 : i32
    return %c0_i32, %arg0 : i32, i32
  }
  func.func @transform_3(%arg0: i32, %arg1: i32, %arg2: i32, %arg3: i32) -> (i32, i32) {
    %c0_i32 = arith.constant 0 : i32
    return %arg1, %arg0 : i32, i32
  }
  func.func @transform_4(%arg0: i32, %arg1: i32, %arg2: i32, %arg3: i32) -> (i32, i32, i32) {
    %c0_i32 = arith.constant 0 : i32
    return %arg2, %arg1, %arg0 : i32, i32, i32
  }
  func.func @transform_5(%arg0: i32, %arg1: i32, %arg2: i32, %arg3: i32) -> (i32, i32) {
    %c0_i32 = arith.constant 0 : i32
    return %arg1, %arg0 : i32, i32
  }
}

</mosaic_0001>

<bundles_post_ra>
// kernel: tpu_custom_call.1
= control target key start
LH: loop header
LB: loop body
LE: loop exit
PB: predicated region body
PF: predicated region fallthrough
CT: control target
= control target key end

     0   :  { %11 = vsyncpa [#allocation5], 0  ;;  %s338_s0 = inlined_call_operand.hbm [shape: f32[1,8,32], index: 0, kind: input, shape index: {}]   ;;  %s339_s1 = inlined_call_operand.vmem [shape: bf16[32,128], index: 1, kind: input, shape index: {}]   ;;  %s340_s2 = inlined_call_operand.vmem [shape: f32[1,128], index: 2, kind: input, shape index: {}]   ;;  %s341_s3 = inlined_call_operand.hbm [shape: f32[8,128], index: 3, kind: input, shape index: {}, may-alias: {3,5}]   ;;  %s342_s4 = inlined_call_operand.hbm [shape: bf16[1,8,128], index: 4, kind: output, shape index: {0}]   ;;  %s343_s5 = inlined_call_operand.hbm [shape: f32[8,128], index: 5, kind: output, shape index: {1}, may-alias: {3,5}]  }
   0x1   :  { %12 = vsyncpa [#allocation8], 0 }
   0x2   :  { %13 = vsyncpa [#allocation6], 0 }
   0x3   :  { %14 = vsyncpa [#allocation11], 0  ;;  %s20_s20 = sshll.u32 %s338_s0, 4  ;;  %s282_s21 = smov [#allocation4]   ;;  %s21_s20 = int_to_ptr.hbm [resolvable:$true] %s20_s20 }
   0x4   :  { %s22_s22 = sshll.u32 %s282_s21, 4  ;;  %s35_s25 = sshll.u32 %s341_s3, 4  ;;  %s23_s22 = int_to_ptr.vmem [resolvable:$true] %s22_s22  ;;  %s36_s25 = int_to_ptr.hbm [resolvable:$true] %s35_s25 }
   0x5   :  { %25 = dma.hbm_to_vmem [thread:$0]  %s21_s20, 128, %s23_s22, [#allocation5]  }
   0x6   :  { %s283_s26 = smov [#allocation7]  }
   0x7   :  { %s37_s27 = sshll.u32 %s283_s26, 4  ;;  %s38_s27 = int_to_ptr.vmem [resolvable:$true] %s37_s27 }
   0x8   :  { %40 = dma.hbm_to_vmem [thread:$0]  %s36_s25, 128, %s38_s27, [#allocation8]  }
   0x9   :  { %274 = dma.done.wait [#allocation5], 128  }
   0xa   :  { %275 = vsyncadd [#allocation5], 4294967168 }
   0xb   :  { %276 = dma.done.wait [#allocation8], 128  }
   0xc   :  { %277 = vsyncadd [#allocation8], 4294967168  ;;  %v171_v0 = vld [vmem:[%s339_s1 + $0x8] sm:$0xff]  ;;  %v170_v1 = vld [vmem:[%s339_s1] sm:$0xff]  ;;  %vm81_vm0 = vcmask 261120   ;;  %v284_v8 = vmov 0.0  }
   0xd   :  { %91 = vmatpush.bf16.msra.mxu0 %v171_v0  ;;  %v63_v2 = vld [vmem:[#allocation4] sm:$0xff]  ;;  %v56_v4 = vld [vmem:[#allocation7] sm:$0xff]  ;;  %s285_s7 = smov [#allocation10]   ;;  %s143_s1 = sshll.u32 %s343_s5, 4  ;;  %s144_s1 = int_to_ptr.hbm [resolvable:$true] %s143_s1 }
   0xe   :  { %v64_v3 = vpack.c.bf16 %v63_v2, %v63_v2  ;;  %v177_v5 = vld [vmem:[%s340_s2] ss:$0 sm:$0xff]  ;;  %vm110_vm1 = vcmp.gt.f32.partialorder %v56_v4, 1.0  ;;  %s141_s8 = sshll.u32 %s285_s7, 4  ;;  %s286_s11 = smov [#allocation9]   ;;  %s142_s8 = int_to_ptr.vmem [resolvable:$true] %s141_s8 }
   0xf   :  { %v168_v9 = vsel %vm110_vm1, 1.0, %v284_v8  ;;  %s130_s12 = sshll.u32 %s286_s11, 4  ;;  %s132_s2 = sshll.u32 %s342_s4, 4  ;;  %s131_s12 = int_to_ptr.vmem [resolvable:$true] %s130_s12  ;;  %s133_s2 = int_to_ptr.hbm [resolvable:$true] %s132_s2 }
  0x11   :  { %92 = vmatpush.bf16.msra.mxu0 %v170_v1 }
  0x14   :  { %167 = vmatmul.msk.bf16.vlgmr.msra.gmra.mxu0 %vm81_vm0, %v64_v3 }
  0x91   :  { %v94_v6 = vpop.f32.mrf.mxu0 }
  0x92   :  { %v108_v7 = vadd.f32 %v177_v5, %v94_v6 }
  0x94   :  { %v113_v10 = vadd.f32 %v108_v7, %v56_v4 }
  0x96   :  { %v114_v11 = vsub.f32 %v113_v10, %v168_v9 }
  0x98   :  { %vm115_vm2 = vcmp.gt.f32.partialorder %v114_v11, 1.0  ;;  %124 = vst [vmem:[#allocation10] sm:$0xff] %v114_v11 }
  0x99   :  { %v96_v12 = vpop.f32.mrf.mxu0  ;;  %v169_v13 = vsel %vm115_vm2, 1.0, %v284_v8  ;;  %146 = dma.vmem_to_hbm [thread:$0]  %s142_s8, 128, %s144_s1, [#allocation11]  }
  0x9a   :  { %v118_v14 = vpack.c.bf16 %v169_v13, %v169_v13 }
  0x9c   :  { %119 = vst [vmem:[#allocation9] sm:$0xf] %v118_v14 }
  0x9d   :  { %135 = dma.vmem_to_hbm [thread:$0]  %s131_s12, 64, %s133_s2, [#allocation6]  }
  0x9e   :  { %278 = dma.done.wait [#allocation6], 64  }
  0x9f   :  { %279 = vsyncadd [#allocation6], 4294967232 }
  0xa0   :  { %280 = dma.done.wait [#allocation11], 128  }
  0xa1   :  { %281 = vsyncadd [#allocation11], 4294967168 }
  0xa2   :  { %155 = vsyncpa [#allocation5], 1 }
  0xa3   :  { %156 = vsyncpa [#allocation8], 1 }
  0xa4   :  { %157 = vsyncpa [#allocation6], 1 }
  0xa5   :  { %158 = vsyncpa [#allocation11], 1 }

</bundles_post_ra>
